<compile_context>
chip_gen: v6e
topology: v6e:2x2x1
jax: 0.10.0
libtpu: 0.0.40
codegen_flags: <defaults>
</compile_context>

<pallas_src>
import functools

import jax
import jax.numpy as jnp
from jax.experimental import pallas as pl
from jax.experimental.pallas import tpu as pltpu


def _bpr_kernel(u_ref, ii_ref, jj_ref, out_ref):
    # u_ref/ii_ref/jj_ref: [F, TB] tiles (factor on sublanes, batch on lanes)
    # out_ref:             [2, TB] lane-dense output tile (row 0: pred_i, row 1: pred_j)
    u = u_ref[...].astype(jnp.float32)
    ii = ii_ref[...].astype(jnp.float32)
    jj = jj_ref[...].astype(jnp.float32)
    pi = jnp.sum(u * ii, axis=0, keepdims=True)
    pj = jnp.sum(u * jj, axis=0, keepdims=True)
    out_ref[...] = jnp.concatenate([pi, pj], axis=0).astype(out_ref.dtype)


@functools.partial(jax.jit, static_argnames=("block_b",))
def bpr_forward(user_weight, item_weight, user, item_i, item_j, block_b=16384):
    """Returns (pred_i, pred_j), each float32 of shape [B]."""
    B = user.shape[0]
    F = user_weight.shape[1]
    emb_dtype = user_weight.dtype
    itemsize = jnp.dtype(emb_dtype).itemsize

    LANE = 128
    B128 = pl.cdiv(B, LANE) * LANE  # batch rounded up to the lane width

    # --- batch tile selection ---------------------------------------------
    # As large as possible (amortize per-grid-step overhead), multiple of 128,
    # but (a) keep >=2 grid steps when the batch allows it so the "parallel"
    # axis can shard across v7x's two TensorCores, and (b) stay inside a
    # conservative VMEM budget with double buffering.
    tb = min(block_b, B128)
    if B128 >= 2 * LANE and tb > B128 // 2:
        tb = (B128 // 2) // LANE * LANE
    # double-buffered bytes per batch column: 3 input tiles (F rows, emb dtype)
    # + 1 output tile (2 rows, f32)
    per_col_bytes = 2 * (3 * F * itemsize + 2 * 4)
    VMEM_BUDGET = 40 * 1024 * 1024  # conservative: fits v7x 64 MiB phys & v5e
    tb = min(tb, max(LANE, (VMEM_BUDGET // per_col_bytes) // LANE * LANE))
    tb = max(LANE, (tb // LANE) * LANE)
    Bp = pl.cdiv(B, tb) * tb

    # Pad the (cheap) index vectors, not the gathered slabs, so the gather +
    # transpose producers can fuse into the pallas input pipeline.
    if Bp != B:
        pad = (0, Bp - B)
        user = jnp.pad(user, pad)
        item_i = jnp.pad(item_i, pad)
        item_j = jnp.pad(item_j, pad)

    # --- glue: embedding gather + layout plumbing (plain JAX) --------------
    # TODO(synk): verify in the HLO that allow_input_fusion fuses these
    # gather+transpose producers into the pallas input pipeline; if not,
    # keep the tables pre-transposed ([F, N]) and gather along axis=1.
    u = jnp.take(user_weight, user, axis=0).T    # [F, Bp]
    ei = jnp.take(item_weight, item_i, axis=0).T  # [F, Bp]
    ej = jnp.take(item_weight, item_j, axis=0).T  # [F, Bp]

    grid = (Bp // tb,)
    emb_spec = pl.BlockSpec((F, tb), lambda b: (0, b))
    out_spec = pl.BlockSpec((2, tb), lambda b: (0, b))

    cost = pl.CostEstimate(
        flops=4 * Bp * F,
        transcendentals=0,
        bytes_accessed=3 * Bp * F * itemsize + 2 * Bp * 4,
    )

    # Explicit VMEM limit so big tiles don't hit the scoped default
    # (16 MiB v5e / 32 MiB v6e, v7x); keep headroom under v7x's 64 MiB phys.
    vmem_limit = int(min(max(per_col_bytes * tb + (4 << 20), 16 << 20), 48 << 20))

    out = pl.pallas_call(
        _bpr_kernel,
        out_shape=jax.ShapeDtypeStruct((2, Bp), jnp.float32),
        grid_spec=pltpu.PrefetchScalarGridSpec(
            num_scalar_prefetch=0,
            grid=grid,
            in_specs=[emb_spec, emb_spec, emb_spec],
            out_specs=out_spec,
        ),
        compiler_params=pltpu.CompilerParams(
            dimension_semantics=("parallel",),
            allow_input_fusion=[True, True, True],
            vmem_limit_bytes=vmem_limit,
        ),
        cost_estimate=cost,
    )(u, ei, ej)

    return out[0, :B], out[1, :B]


def init_bpr_params(key, user_num, item_num, factor_num, dtype=jnp.float32):
    """nn.init.normal_(std=0.01); factor dim padded to the sublane multiple
    (8 for f32, 16 for bf16) with zeros so per-tile DMAs carry no padding."""
    ku, ki = jax.random.split(key)
    itemsize = jnp.dtype(dtype).itemsize
    sub = 8 * (4 // itemsize)
    f_pad = pl.cdiv(factor_num, sub) * sub
    user_w = 0.01 * jax.random.normal(ku, (user_num, factor_num), jnp.float32)
    item_w = 0.01 * jax.random.normal(ki, (item_num, factor_num), jnp.float32)
    if f_pad != factor_num:
        user_w = jnp.pad(user_w, ((0, 0), (0, f_pad - factor_num)))
        item_w = jnp.pad(item_w, ((0, 0), (0, f_pad - factor_num)))
    return user_w.astype(dtype), item_w.astype(dtype)


if __name__ == "__main__":
    key = jax.random.PRNGKey(0)
    user_num, item_num, factor_num = 16, 32, 32
    batch = 8

    kp, k1, k2, k3 = jax.random.split(key, 4)
    user = jax.random.randint(k1, (batch,), 0, user_num, dtype=jnp.int32)
    item_i = jax.random.randint(k2, (batch,), 0, item_num, dtype=jnp.int32)
    item_j = jax.random.randint(k3, (batch,), 0, item_num, dtype=jnp.int32)

    # ---- f32 tables: matches the PyTorch reference exactly ----
    uw32, iw32 = init_bpr_params(kp, user_num, item_num, factor_num, jnp.float32)
    pred_i, pred_j = bpr_forward(uw32, iw32, user, item_i, item_j)
    jax.block_until_ready((pred_i, pred_j))

    ru = uw32[user]
    ref_i = (ru * iw32[item_i]).sum(-1)
    ref_j = (ru * iw32[item_j]).sum(-1)
    assert pred_i.shape == (batch,) and pred_j.shape == (batch,)
    assert jnp.allclose(pred_i, ref_i, atol=1e-6), "pred_i mismatch (f32)"
    assert jnp.allclose(pred_j, ref_j, atol=1e-6), "pred_j mismatch (f32)"

    # ---- bf16 tables: halves HBM input bytes; kernel reduces in f32 ----
    uwbf, iwbf = init_bpr_params(kp, user_num, item_num, factor_num, jnp.bfloat16)
    pib, pjb = bpr_forward(uwbf, iwbf, user, item_i, item_j)
    jax.block_until_ready((pib, pjb))

    rub = uwbf.astype(jnp.float32)[user]
    refb_i = (rub * iwbf.astype(jnp.float32)[item_i]).sum(-1)
    refb_j = (rub * iwbf.astype(jnp.float32)[item_j]).sum(-1)
    assert jnp.allclose(pib, refb_i, atol=1e-5), "pred_i mismatch (bf16)"
    assert jnp.allclose(pjb, refb_j, atol=1e-5), "pred_j mismatch (bf16)"

    print("KERNEL_OK")
</pallas_src>

<mosaic_0001>
module attributes {stable_mosaic.version = 11 : i64} {
  func.func @_bpr_kernel(%arg0: i32, %arg1: memref<32x128xf32, #tpu.memory_space<vmem>>, %arg2: memref<32x128xf32, #tpu.memory_space<vmem>>, %arg3: memref<32x128xf32, #tpu.memory_space<vmem>>, %arg4: memref<2x128xf32, #tpu.memory_space<vmem>>) attributes {dimension_semantics = [#tpu.dimension_semantics<parallel>], iteration_bounds = array<i64: 1>, scalar_prefetch = 0 : i64, scratch_operands = 0 : i64, tpu.core_type = #tpu.core_type<tc>, window_params = [{transform_indices = @transform_0, window_bounds = array<i64: 32, 128>}, {transform_indices = @transform_1, window_bounds = array<i64: 32, 128>}, {transform_indices = @transform_2, window_bounds = array<i64: 32, 128>}, {transform_indices = @transform_3, window_bounds = array<i64: 2, 128>}]} {
    %c0 = arith.constant 0 : index
    %c0_0 = arith.constant 0 : index
    %0 = vector.load %arg1[%c0, %c0_0] : memref<32x128xf32, #tpu.memory_space<vmem>>, vector<32x128xf32>
    %c0_1 = arith.constant 0 : index
    %c0_2 = arith.constant 0 : index
    %1 = vector.load %arg2[%c0_1, %c0_2] : memref<32x128xf32, #tpu.memory_space<vmem>>, vector<32x128xf32>
    %c0_3 = arith.constant 0 : index
    %c0_4 = arith.constant 0 : index
    %2 = vector.load %arg3[%c0_3, %c0_4] : memref<32x128xf32, #tpu.memory_space<vmem>>, vector<32x128xf32>
    %3 = arith.mulf %0, %1 : vector<32x128xf32>
    %cst = arith.constant dense<0.000000e+00> : vector<128xf32>
    %4 = vector.multi_reduction <add>, %3, %cst [0] : vector<32x128xf32> to vector<128xf32>
    %5 = vector.shape_cast %4 : vector<128xf32> to vector<1x128xf32>
    %6 = arith.mulf %0, %2 : vector<32x128xf32>
    %cst_5 = arith.constant dense<0.000000e+00> : vector<128xf32>
    %7 = vector.multi_reduction <add>, %6, %cst_5 [0] : vector<32x128xf32> to vector<128xf32>
    %8 = vector.shape_cast %7 : vector<128xf32> to vector<1x128xf32>
    %9 = tpu.concatenate %5, %8 in 0 : vector<1x128xf32>, vector<1x128xf32> -> vector<2x128xf32>
    %c0_6 = arith.constant 0 : index
    %c0_7 = arith.constant 0 : index
    %10 = vector.load %arg4[%c0_6, %c0_7] : memref<2x128xf32, #tpu.memory_space<vmem>>, vector<2x128xf32>
    tpu.vector_store %arg4[%c0_6, %c0_7], %9 {strides = array<i32>} : memref<2x128xf32, #tpu.memory_space<vmem>>, vector<2x128xf32>,
    return
  }
  func.func @transform_0(%arg0: i32) -> (i32, i32) {
    %c0_i32 = arith.constant 0 : i32
    %c0_i32_0 = arith.constant 0 : i32
    return %c0_i32, %arg0 : i32, i32
  }
  func.func @transform_1(%arg0: i32) -> (i32, i32) {
    %c0_i32 = arith.constant 0 : i32
    %c0_i32_0 = arith.constant 0 : i32
    return %c0_i32, %arg0 : i32, i32
  }
  func.func @transform_2(%arg0: i32) -> (i32, i32) {
    %c0_i32 = arith.constant 0 : i32
    %c0_i32_0 = arith.constant 0 : i32
    return %c0_i32, %arg0 : i32, i32
  }
  func.func @transform_3(%arg0: i32) -> (i32, i32) {
    %c0_i32 = arith.constant 0 : i32
    %c0_i32_0 = arith.constant 0 : i32
    return %c0_i32, %arg0 : i32, i32
  }
}

</mosaic_0001>

<bundles_post_ra>
// kernel: bpr_forward.2
= control target key start
LH: loop header
LB: loop body
LE: loop exit
PB: predicated region body
PF: predicated region fallthrough
CT: control target
= control target key end

     0   :  { %vm203_vm3 = vcmask 1040384   ;;  %s322_s0 = inlined_call_operand.vmem [shape: f32[128,32], index: 0, kind: input, shape index: {}]   ;;  %s323_s1 = inlined_call_operand.vmem [shape: f32[128,32], index: 1, kind: input, shape index: {}]   ;;  %s324_s2 = inlined_call_operand.vmem [shape: f32[128,32], index: 2, kind: input, shape index: {}]   ;;  %s325_s3 = inlined_call_operand.<no memory space> [shape: f32[], index: 3, kind: input, shape index: {}]   ;;  %s326_s4 = inlined_call_operand.vmem [shape: pred[128], index: 4, kind: input, shape index: {}]   ;;  %s327_s5 = inlined_call_operand.vmem [shape: pred[128], index: 5, kind: input, shape index: {}]   ;;  %s328_s6 = inlined_call_operand.vmem [shape: pred[128], index: 6, kind: input, shape index: {}]   ;;  %s329_s7 = inlined_call_operand.vmem [shape: f32[2,128], index: 7, kind: output, shape index: {}]  }
   0x1   :  { %v12_v0 = vstv %s325_s3  ;;  %v27_v1 = vld [vmem:[%s324_s2] sm:$0xff]  ;;  %v210_v4 = vld [vmem:[%s324_s2 + $0x8] sm:$0xff]  ;;  %v211_v5 = vld [vmem:[%s324_s2 + $0x10] sm:$0xff] }
   0x2   :  { %v28_v2 = vld [vmem:[%s328_s6] ss:$0 sm:$0xff]  ;;  %v212_v6 = vld [vmem:[%s324_s2 + $0x18] sm:$0xff]  ;;  %v213_v9 = vld [vmem:[%s323_s1 + $0x8] sm:$0xff] }
   0x3   :  { %v31_v3 = vand.u32 255, %v28_v2  ;;  %v73_v7 = vld [vmem:[%s323_s1] sm:$0xff]  ;;  %v214_v11 = vld [vmem:[%s323_s1 + $0x10] sm:$0xff]  ;;  %v215_v12 = vld [vmem:[%s323_s1 + $0x18] sm:$0xff] }
   0x4   :  { %v74_v8 = vld [vmem:[%s327_s5] ss:$0 sm:$0xff]  ;;  %v216_v21 = vld [vmem:[%s322_s0 + $0x8] sm:$0xff]  ;;  %v217_v22 = vld [vmem:[%s322_s0 + $0x10] sm:$0xff] }
   0x5   :  { %vm34_vm0 = vcmp.ne.s32.totalorder %v31_v3, 0  ;;  %v77_v10 = vand.u32 255, %v74_v8  ;;  %v120_v13 = vld [vmem:[%s326_s4] ss:$0 sm:$0xff]  ;;  %v218_v23 = vld [vmem:[%s322_s0 + $0x18] sm:$0xff] }
   0x6   :  { %v35_v14 = vsel %vm34_vm0, %v27_v1, %v12_v0  ;;  %v45_v15 = vsel %vm34_vm0, %v210_v4, %v12_v0  ;;  %v56_v16 = vsel %vm34_vm0, %v211_v5, %v12_v0  ;;  %v119_v17 = vld [vmem:[%s322_s0] sm:$0xff]  ;;  %v67_v18 = vsel %vm34_vm0, %v212_v6, %v12_v0 }
   0x7   :  { %vm298_vm1 = vcmp.ne.s32.totalorder %v77_v10, 0  ;;  %v123_v20 = vand.u32 255, %v120_v13 }
   0x8   :  { %v81_v24 = vsel %vm298_vm1, %v73_v7, %v12_v0  ;;  %v91_v25 = vsel %vm298_vm1, %v213_v9, %v12_v0  ;;  %v102_v26 = vsel %vm298_vm1, %v214_v11, %v12_v0  ;;  %v113_v27 = vsel %vm298_vm1, %v215_v12, %v12_v0 }
   0x9   :  { %vm126_vm2 = vcmp.ne.s32.totalorder %v123_v20, 0  ;;  %v177_v28 = vmul.f32 %v81_v24, %v35_v14  ;;  %v178_v29 = vmul.f32 %v91_v25, %v45_v15  ;;  %v179_v30 = vmul.f32 %v102_v26, %v56_v16 }
   0xa   :  { %v127_v31 = vsel %vm126_vm2, %v119_v17, %v12_v0  ;;  %v137_v32 = vsel %vm126_vm2, %v216_v21, %v12_v0  ;;  %v148_v33 = vsel %vm126_vm2, %v217_v22, %v12_v0  ;;  %v159_v34 = vsel %vm126_vm2, %v218_v23, %v12_v0 }
   0xb   :  { %v180_v35 = vmul.f32 %v113_v27, %v67_v18  ;;  %v181_v36 = vadd.f32 %v178_v29, %v177_v28  ;;  %v190_v37 = vmul.f32 %v127_v31, %v35_v14  ;;  %v191_v38 = vmul.f32 %v137_v32, %v45_v15 }
   0xc   :  { %v192_v39 = vmul.f32 %v148_v33, %v56_v16  ;;  %v193_v41 = vmul.f32 %v159_v34, %v67_v18 }
   0xd   :  { %v182_v40 = vadd.f32 %v181_v36, %v179_v30  ;;  %v194_v42 = vadd.f32 %v191_v38, %v190_v37 }
   0xf   :  { %v183_v43 = vadd.f32 %v182_v40, %v180_v35  ;;  %v195_v44 = vadd.f32 %v194_v42, %v192_v39 }
  0x11   :  { %v184_v45 = vrot.slane %v183_v43, 4  ;;  %v196_v46 = vadd.f32 %v195_v44, %v193_v41 }
  0x13   :  { %v185_v47 = vadd.f32 %v184_v45, %v183_v43  ;;  %v197_v48 = vrot.slane %v196_v46, 4 }
  0x15   :  { %v186_v49 = vrot.slane %v185_v47, 2  ;;  %v198_v50 = vadd.f32 %v197_v48, %v196_v46 }
  0x17   :  { %v187_v51 = vadd.f32 %v186_v49, %v185_v47  ;;  %v199_v52 = vrot.slane %v198_v50, 2 }
  0x19   :  { %v188_v53 = vrot.slane %v187_v51, 1  ;;  %v200_v54 = vadd.f32 %v199_v52, %v198_v50 }
  0x1b   :  { %v189_v55 = vadd.f32 %v188_v53, %v187_v51  ;;  %v201_v56 = vrot.slane %v200_v54, 1 }
  0x1d   :  { %v202_v57 = vadd.f32 %v201_v56, %v200_v54 }
  0x1f   :  { %v204_v58 = vsel %vm203_vm3, %v189_v55, %v202_v57 }
  0x20   :  { %205 = vst [vmem:[%s329_s7] sm:$0x3] %v204_v58 }

</bundles_post_ra>
